<compile_context>
chip_gen: v7x
topology: tpu7x:2x2x1
jax: 0.10.0
libtpu: 0.0.40
codegen_flags: <defaults>
</compile_context>

<pallas_src>
import jax
import jax.numpy as jnp
from jax.experimental import pallas as pl
from jax.experimental.pallas import tpu as pltpu


def _hierarch_fcn_kernel(x_ref, w_ref, b_ref, o_ref):
    # x_ref: (TM, D)        row tile of flattened (G*N, d_model) activations
    # w_ref: (Npad, D)      fused [w_vis; w_z; zeros] in torch (out, in) layout
    # b_ref: (1, Npad)      fused [b_vis, b_z, zeros] bias (f32)
    # o_ref: (TM, Npad)     lane-dense fused output slab
    acc = jax.lax.dot_general(
        x_ref[...], w_ref[...],
        dimension_numbers=(((1,), (1,)), ((), ())),   # contract on D, RHS pre-transposed
        preferred_element_type=jnp.float32,
    )
    o_ref[...] = (acc + b_ref[...]).astype(o_ref.dtype)


def hierarch_fcn(out, w_vis, b_vis, w_z, b_z, *, tm=1024):
    """Pallas implementation of HierarchFCN.forward.

    out:   (G, N, d_model)
    w_vis: (2, d_model)      torch nn.Linear weight layout (out, in)
    b_vis: (2,)
    w_z:   (dim_z, d_model)
    b_z:   (dim_z,)
    returns (visibility_logits[1,G,N,2], z[1,G,N,dim_z])
    """
    G, N, D = out.shape
    dim_z = w_z.shape[0]
    n_out = 2 + dim_z
    n_pad = ((n_out + 127) // 128) * 128        # lane-dense output width
    M = G * N

    x = out.reshape(M, D)

    # Fused weight/bias (no transposes; zero-pad to the padded lane width).
    w_fused = jnp.zeros((n_pad, D), dtype=out.dtype)
    w_fused = w_fused.at[:2, :].set(w_vis.astype(out.dtype))
    w_fused = w_fused.at[2:n_out, :].set(w_z.astype(out.dtype))
    b_fused = jnp.zeros((1, n_pad), dtype=jnp.float32)
    b_fused = b_fused.at[0, :2].set(b_vis.astype(jnp.float32))
    b_fused = b_fused.at[0, 2:n_out].set(b_z.astype(jnp.float32))

    # Row tile: multiple of 8, capped by the (padded) problem size.  At
    # tm=1024, d_model=256 the double-buffered working set is only a few MiB,
    # comfortably inside even v7x's scoped-VMEM default.
    m_pad8 = ((M + 7) // 8) * 8
    tm = max(8, min(((tm + 7) // 8) * 8, m_pad8))
    m_pad = ((M + tm - 1) // tm) * tm
    if m_pad != M:
        x = jnp.pad(x, ((0, m_pad - M), (0, 0)))

    grid = (m_pad // tm,)

    fused_out = pl.pallas_call(
        _hierarch_fcn_kernel,
        out_shape=jax.ShapeDtypeStruct((m_pad, n_pad), out.dtype),
        grid=grid,
        in_specs=[
            pl.BlockSpec((tm, D), lambda i: (i, 0)),       # x: streamed per tile
            pl.BlockSpec((n_pad, D), lambda i: (0, 0)),    # fused weight: resident
            pl.BlockSpec((1, n_pad), lambda i: (0, 0)),    # fused bias: resident
        ],
        out_specs=pl.BlockSpec((tm, n_pad), lambda i: (i, 0)),
        compiler_params=pltpu.CompilerParams(
            dimension_semantics=("parallel",),
        ),
    )(x, w_fused, b_fused)

    fused_out = fused_out[:M]
    visibility_logits = fused_out[:, :2].reshape(G, N, 2)[None, ...]
    z = fused_out[:, 2:n_out].reshape(G, N, dim_z)[None, ...]
    return visibility_logits, z


def _init_linear(key, out_features, in_features):
    # Deterministic init mimicking torch.nn.Linear default (uniform bound).
    kw, kb = jax.random.split(key)
    bound = 1.0 / jnp.sqrt(jnp.float32(in_features))
    w = jax.random.uniform(kw, (out_features, in_features),
                           minval=-bound, maxval=bound, dtype=jnp.float32)
    b = jax.random.uniform(kb, (out_features,),
                           minval=-bound, maxval=bound, dtype=jnp.float32)
    return w, b


if __name__ == "__main__":
    d_model = 32
    dim_z = 16
    G, N = 8, 4

    key = jax.random.PRNGKey(0)
    k_x, k_vis, k_z = jax.random.split(key, 3)

    x = jax.random.normal(k_x, (G, N, d_model), dtype=jnp.float32)
    w_vis, b_vis = _init_linear(k_vis, 2, d_model)
    w_z, b_z = _init_linear(k_z, dim_z, d_model)

    vis_logits, z = hierarch_fcn(x, w_vis, b_vis, w_z, b_z)
    jax.block_until_ready((vis_logits, z))

    # Reference check against plain JAX (same semantics as torch Linear).
    ref_vis = (x @ w_vis.T + b_vis)[None, ...]
    ref_z = (x @ w_z.T + b_z)[None, ...]
    assert vis_logits.shape == (1, G, N, 2)
    assert z.shape == (1, G, N, dim_z)
    assert jnp.allclose(vis_logits, ref_vis, atol=1e-5)
    assert jnp.allclose(z, ref_z, atol=1e-5)

    print("KERNEL_OK")
</pallas_src>

<mosaic_0001>
module attributes {stable_mosaic.version = 11 : i64} {
  func.func @_hierarch_fcn_kernel(%arg0: i32, %arg1: memref<32x32xf32, #tpu.memory_space<vmem>>, %arg2: memref<128x32xf32, #tpu.memory_space<vmem>>, %arg3: memref<1x128xf32, #tpu.memory_space<vmem>>, %arg4: memref<32x128xf32, #tpu.memory_space<vmem>>) attributes {dimension_semantics = [#tpu.dimension_semantics<parallel>], iteration_bounds = array<i64: 1>, scalar_prefetch = 0 : i64, scratch_operands = 0 : i64, tpu.core_type = #tpu.core_type<tc>, window_params = [{transform_indices = @transform_0, window_bounds = array<i64: 32, 32>}, {pipeline_mode = #tpu.pipeline_mode<synchronous>, transform_indices = @transform_1, window_bounds = array<i64: 128, 32>}, {pipeline_mode = #tpu.pipeline_mode<synchronous>, transform_indices = @transform_2, window_bounds = array<i64: 1, 128>}, {transform_indices = @transform_3, window_bounds = array<i64: 32, 128>}]} {
    %c0 = arith.constant 0 : index
    %c0_0 = arith.constant 0 : index
    %0 = vector.load %arg1[%c0, %c0_0] : memref<32x32xf32, #tpu.memory_space<vmem>>, vector<32x32xf32>
    %c0_1 = arith.constant 0 : index
    %c0_2 = arith.constant 0 : index
    %1 = vector.load %arg2[%c0_1, %c0_2] : memref<128x32xf32, #tpu.memory_space<vmem>>, vector<128x32xf32>
    %cst = arith.constant dense<0.000000e+00> : vector<32x128xf32>
    %2 = tpu.matmul %0, %1, %cst {dimension_numbers = #tpu.dot_dimension_numbers<[1], [1], [0], [0], [0, 0, 1, 0], [], []>} : vector<32x32xf32>, vector<128x32xf32>, vector<32x128xf32> -> vector<32x128xf32>
    %c0_3 = arith.constant 0 : index
    %c0_4 = arith.constant 0 : index
    %3 = vector.load %arg3[%c0_3, %c0_4] : memref<1x128xf32, #tpu.memory_space<vmem>>, vector<1x128xf32>
    %4 = vector.broadcast %3 : vector<1x128xf32> to vector<32x128xf32>
    %5 = arith.addf %2, %4 : vector<32x128xf32>
    %c0_5 = arith.constant 0 : index
    %c0_6 = arith.constant 0 : index
    %6 = vector.load %arg4[%c0_5, %c0_6] : memref<32x128xf32, #tpu.memory_space<vmem>>, vector<32x128xf32>
    tpu.vector_store %arg4[%c0_5, %c0_6], %5 {strides = array<i32>} : memref<32x128xf32, #tpu.memory_space<vmem>>, vector<32x128xf32>,
    return
  }
  func.func @transform_0(%arg0: i32) -> (i32, i32) {
    %c0_i32 = arith.constant 0 : i32
    %c0_i32_0 = arith.constant 0 : i32
    return %arg0, %c0_i32 : i32, i32
  }
  func.func @transform_1(%arg0: i32) -> (i32, i32) {
    %c0_i32 = arith.constant 0 : i32
    %c0_i32_0 = arith.constant 0 : i32
    %c0_i32_1 = arith.constant 0 : i32
    return %c0_i32, %c0_i32_0 : i32, i32
  }
  func.func @transform_2(%arg0: i32) -> (i32, i32) {
    %c0_i32 = arith.constant 0 : i32
    %c0_i32_0 = arith.constant 0 : i32
    %c0_i32_1 = arith.constant 0 : i32
    return %c0_i32, %c0_i32_0 : i32, i32
  }
  func.func @transform_3(%arg0: i32) -> (i32, i32) {
    %c0_i32 = arith.constant 0 : i32
    %c0_i32_0 = arith.constant 0 : i32
    return %arg0, %c0_i32 : i32, i32
  }
}

</mosaic_0001>

<bundles_post_ra>
// kernel: tpu_custom_call.1
= control target key start
LH: loop header
LB: loop body
LE: loop exit
PB: predicated region body
PF: predicated region fallthrough
CT: control target
= control target key end

     0   :  { %vm42_vm0 = vcmask 261120   ;;  %s550_s0 = inlined_call_operand.vmem [shape: f32[32,32], index: 0, kind: input, shape index: {}]   ;;  %s551_s1 = inlined_call_operand.vmem [shape: f32[128,32], index: 1, kind: input, shape index: {}]   ;;  %s552_s2 = inlined_call_operand.vmem [shape: f32[1,128], index: 2, kind: input, shape index: {}]   ;;  %s553_s3 = inlined_call_operand.hbm [shape: f32[32,128], index: 3, kind: output, shape index: {}]  }
   0x1   :  { %v19_v0 = vld [vmem:[%s551_s1] sm:$0xff]  ;;  %v20_v1 = vld [vmem:[%s551_s1 + $0x8] sm:$0xff]  ;;  %v21_v2 = vld [vmem:[%s551_s1 + $0x10] sm:$0xff] }
   0x2   :  { %v287_v3 = vpack.c.bf16 %v20_v1, %v19_v0  ;;  %vm412_vm1 = vmpackc.low %vm42_vm0, %vm42_vm0  ;;  %v22_v5 = vld [vmem:[%s551_s1 + $0x18] sm:$0xff]  ;;  %v15_v7 = vld [vmem:[%s550_s0] sm:$0xff] }
   0x3   :  { %v293_v6 = vpack.c.bf16 %v22_v5, %v21_v2  ;;  %v23_v8 = vld [vmem:[%s551_s1 + $0x20] sm:$0xff]  ;;  %v24_v9 = vld [vmem:[%s551_s1 + $0x28] sm:$0xff]  ;;  %281 = vmatprep.mubr.msk.f32.mxu0 %vm42_vm0, %v15_v7  ;;  %v17_v10 = vld [vmem:[%s550_s0 + $0x10] sm:$0xff] }
   0x4   :  { %289 = vmatprep.subr.msk.bf16.mxu0 %vm412_vm1, %v287_v3  ;;  %335 = vmatprep.subr.msk.bf16.mxu1 %vm412_vm1, %v287_v3 }
   0x5   :  { %292 = vmatpush3.bf16.xpose.msk.msra.mxu0 %vm412_vm1, %v287_v3  ;;  %343 = vmatpush3.bf16.xpose.msk.msra.mxu1 %vm412_vm1, %v287_v3 }
   0x6   :  { %295 = vmatprep.subr.msk.bf16.mxu0 %vm412_vm1, %v293_v6  ;;  %336 = vmatprep.subr.msk.bf16.mxu1 %vm412_vm1, %v293_v6 }
   0x7   :  { %284 = vmatprep.mubr.msk.f32.mxu1 %vm42_vm0, %v17_v10 }
   0x8   :  { %8 = vsyncpa [#allocation3], 0  ;;  %v299_v11 = vpack.c.bf16 %v24_v9, %v23_v8  ;;  %v25_v12 = vld [vmem:[%s551_s1 + $0x30] sm:$0xff]  ;;  %v26_v13 = vld [vmem:[%s551_s1 + $0x38] sm:$0xff]  ;;  %s378_s26 = smov [#allocation2]  }
   0x9   :  { %v305_v14 = vpack.c.bf16 %v26_v13, %v25_v12  ;;  %v27_v15 = vld [vmem:[%s551_s1 + $0x40] sm:$0xff]  ;;  %v28_v16 = vld [vmem:[%s551_s1 + $0x48] sm:$0xff]  ;;  %v29_v18 = vld [vmem:[%s551_s1 + $0x50] sm:$0xff]  ;;  %s197_s27 = sshll.u32 %s378_s26, 4  ;;  %s198_s27 = int_to_ptr.vmem [resolvable:$true] %s197_s27 }
   0xa   :  { %v311_v17 = vpack.c.bf16 %v28_v16, %v27_v15  ;;  %v30_v19 = vld [vmem:[%s551_s1 + $0x58] sm:$0xff]  ;;  %v31_v21 = vld [vmem:[%s551_s1 + $0x60] sm:$0xff]  ;;  %v32_v22 = vld [vmem:[%s551_s1 + $0x68] sm:$0xff]  ;;  %p359_p1 = scmp.lt.s32.totalorder %s198_s27, %s198_s27 }
   0xb   :  { %v317_v20 = vpack.c.bf16 %v30_v19, %v29_v18  ;;  %v323_v23 = vpack.c.bf16 %v32_v22, %v31_v21  ;;  %v33_v24 = vld [vmem:[%s551_s1 + $0x70] sm:$0xff]  ;;  %v34_v25 = vld [vmem:[%s551_s1 + $0x78] sm:$0xff]  ;;  %v16_v27 = vld [vmem:[%s550_s0 + $0x8] sm:$0xff] }
   0xc   :  { %v329_v26 = vpack.c.bf16 %v34_v25, %v33_v24  ;;  %v18_v28 = vld [vmem:[%s550_s0 + $0x18] sm:$0xff]  ;;  %v208_v29 = vld [vmem:[%s552_s2] ss:$0 sm:$0xff]  ;;  %s354_s0 = scalar_lea.vmem %s198_s27, 512 }
   0xd   :  { %298 = vmatpush3.bf16.xpose.msk.msra.mxu0 %vm412_vm1, %v293_v6  ;;  %344 = vmatpush3.bf16.xpose.msk.msra.mxu1 %vm412_vm1, %v293_v6  ;;  %p355_p0 = scmp.ne.s32.totalorder %s198_s27, %s354_s0  ;;  %p360_p2 = scmp.lt.s32.totalorder %s354_s0, %s354_s0 }
   0xe   :  { %301 = vmatprep.subr.msk.bf16.mxu0 %vm412_vm1, %v299_v11  ;;  %337 = vmatprep.subr.msk.bf16.mxu1 %vm412_vm1, %v299_v11 }
   0xf   :  { %p361_p3 = por %p360_p2, %p359_p1 }
  0x11   :  { %p362_p4 = pnand %p361_p3, %p355_p0 }
  0x15   :  { %304 = vmatpush3.bf16.xpose.msk.msra.mxu0 %vm412_vm1, %v299_v11  ;;  %345 = vmatpush3.bf16.xpose.msk.msra.mxu1 %vm412_vm1, %v299_v11 }
  0x16   :  { %307 = vmatprep.subr.msk.bf16.mxu0 %vm412_vm1, %v305_v14  ;;  %338 = vmatprep.subr.msk.bf16.mxu1 %vm412_vm1, %v305_v14 }
  0x1d   :  { %310 = vmatpush3.bf16.xpose.msk.msra.mxu0 %vm412_vm1, %v305_v14  ;;  %346 = vmatpush3.bf16.xpose.msk.msra.mxu1 %vm412_vm1, %v305_v14 }
  0x1e   :  { %313 = vmatprep.subr.msk.bf16.mxu0 %vm412_vm1, %v311_v17  ;;  %339 = vmatprep.subr.msk.bf16.mxu1 %vm412_vm1, %v311_v17 }
  0x25   :  { %316 = vmatpush3.bf16.xpose.msk.msra.mxu0 %vm412_vm1, %v311_v17  ;;  %347 = vmatpush3.bf16.xpose.msk.msra.mxu1 %vm412_vm1, %v311_v17 }
  0x26   :  { %319 = vmatprep.subr.msk.bf16.mxu0 %vm412_vm1, %v317_v20  ;;  %340 = vmatprep.subr.msk.bf16.mxu1 %vm412_vm1, %v317_v20 }
  0x2d   :  { %322 = vmatpush3.bf16.xpose.msk.msra.mxu0 %vm412_vm1, %v317_v20  ;;  %348 = vmatpush3.bf16.xpose.msk.msra.mxu1 %vm412_vm1, %v317_v20 }
  0x2e   :  { %325 = vmatprep.subr.msk.bf16.mxu0 %vm412_vm1, %v323_v23  ;;  %341 = vmatprep.subr.msk.bf16.mxu1 %vm412_vm1, %v323_v23 }
  0x35   :  { %328 = vmatpush3.bf16.xpose.msk.msra.mxu0 %vm412_vm1, %v323_v23  ;;  %349 = vmatpush3.bf16.xpose.msk.msra.mxu1 %vm412_vm1, %v323_v23 }
  0x36   :  { %331 = vmatprep.subr.msk.bf16.mxu0 %vm412_vm1, %v329_v26  ;;  %342 = vmatprep.subr.msk.bf16.mxu1 %vm412_vm1, %v329_v26 }
  0x3d   :  { %334 = vmatpush3.bf16.xpose.msk.msra.mxu0 %vm412_vm1, %v329_v26  ;;  %350 = vmatpush3.bf16.xpose.msk.msra.mxu1 %vm412_vm1, %v329_v26 }
  0x44   :  { %282 = vmatmul.mubr.msk.f32.vlgmr.msra.gmra.mrb[0].mxu0 %vm42_vm0, %v16_v27  ;;  %285 = vmatmul.mubr.msk.f32.vlgmr.msra.gmra.mrb[0].mxu1 %vm42_vm0, %v18_v28 }
 0x117   :  { %v283_v30 = vpop.f32.mrb[0].mxu0  ;;  %v286_v31 = vpop.f32.mrb[0].mxu1 }
 0x118   :  { %v175_v32 = vadd.f32 %v283_v30, %v208_v29  ;;  %v185_v33 = vadd.f32 %v286_v31, %v208_v29  ;;  %v169_v34 = vpop.f32.mrb[1].mxu0  ;;  %v179_v35 = vpop.f32.mrb[1].mxu1 }
 0x119   :  { %v170_v36 = vadd.f32 %v208_v29, %v169_v34  ;;  %v180_v37 = vadd.f32 %v208_v29, %v179_v35 }
 0x11a   :  { %189 = vst [vmem:[#allocation2 + $0x8] sm:$0xff] %v175_v32  ;;  %191 = vst [vmem:[#allocation2 + $0x18] sm:$0xff] %v185_v33 }
 0x11b   :  { %188 = vst [vmem:[#allocation2] sm:$0xff] %v170_v36  ;;  %190 = vst [vmem:[#allocation2 + $0x10] sm:$0xff] %v180_v37 }
 0x11c   :  { %365 = shalt.err (!%p362_p4)
}
 0x11d   :  { %s366_s29 = scalar_lea.hbm %s553_s3, 512 }
 0x11e   :  { %p367_p5 = scmp.ne.s32.totalorder %s553_s3, %s366_s29  ;;  %p370_p6 = scmp.lt.u32.totalorder %s366_s29, %s553_s3 }
 0x120   :  { %p372_p7 = pnand %p370_p6, %p367_p5 }
 0x122   :  { %375 = shalt.err (!%p372_p7)
}
 0x123   :  { %s379_s7 = smov 128   ;;  %s380_s8 = smov 8  }
 0x124   :  { %203 = dma.vmem_to_hbm [thread:$0]  %s198_s27, 512, %s553_s3, [#allocation3], %s379_s7, %s379_s7, %s380_s8  }
 0x125   :  { %376 = dma.done.wait [#allocation3], 512  }
 0x126   :  { %377 = vsyncadd [#allocation3], 4294966784 }
 0x127   :  { %207 = vsyncpa [#allocation3], 1 }

</bundles_post_ra>
